<compile_context>
chip_gen: v6e
topology: v6e:2x2x1
jax: 0.10.0
libtpu: 0.0.40
codegen_flags: <defaults>
</compile_context>

<pallas_src>
import functools

import jax
import jax.numpy as jnp
from jax import lax
from jax.experimental import pallas as pl
from jax.experimental.pallas import tpu as pltpu

LANES = 128
SUBLANES_BF16 = 16
NEG_INF = -1e30            # finite "masked" logit: exp underflows to 0, no 0*inf NaN
VMEM_LIMIT = 48 * 1024 * 1024
BLOCK_K = 512              # memory-bank K-tile (2 bf16 buffers of dim_sub x 512)


def _round_up(x, m):
    return ((x + m - 1) // m) * m


def _pad2d(a, rows, cols, fill=0.0):
    return jnp.pad(a, ((0, rows - a.shape[0]), (0, cols - a.shape[1])),
                   constant_values=fill)


# ----------------------------------------------------------------------------
# Kernel 1: dual (student + EMA teacher) encoder forward
#   feat   = relu(x @ Wbb_folded + bbb)            (synthetic backbone)
#   [h|lg] = feat @ [W1 | Wfc] + [b1 | bfc]        (fused head + fc)
#   emb    = relu(h) @ W2 + b2 ;  emb <- emb * rsqrt(||emb||^2)   (bf16 out)
# Grid = (model in {student, teacher}, batch-block); weights stay VMEM-resident
# per model; leading model axis lets v7x megacore split the two models.
# ----------------------------------------------------------------------------
def encoder_kernel(x_ref, wbb_ref, bbb_ref, wh_ref, bh_ref, w2_ref, b2_ref,
                   logits_ref, emb_ref, *, c_out_p):
    x = x_ref[...]                                                  # (TB, L) bf16
    feat = jnp.maximum(
        jnp.dot(x, wbb_ref[...], preferred_element_type=jnp.float32)
        + bbb_ref[...], 0.0)                                        # (TB, Cp) f32
    z = jnp.dot(feat.astype(jnp.bfloat16), wh_ref[...],
                preferred_element_type=jnp.float32) + bh_ref[...]   # (TB, Cp+NCp)
    h = jnp.maximum(z[:, :c_out_p], 0.0)
    logits_ref[...] = z[:, c_out_p:]
    emb = jnp.dot(h.astype(jnp.bfloat16), w2_ref[...],
                  preferred_element_type=jnp.float32) + b2_ref[...]
    ss = jnp.sum(emb * emb, axis=-1, keepdims=True)
    emb_ref[...] = (emb * lax.rsqrt(jnp.maximum(ss, 1e-24))).astype(emb_ref.dtype)


def prepare_encoder_params(params, L, out_channels, num_classes, dim):
    """Fold the 32x channel repeat into Wbb, pad channel/class widths to 128
    lanes, dim only to the bf16 sublane multiple (16), fuse head-layer-1 with
    the classifier, cast matmul weights to bf16."""
    c_out_p = _round_up(out_channels, LANES)
    nc_p = _round_up(num_classes, LANES)
    dim_sub = _round_up(dim, SUBLANES_BF16)
    # x.repeat(1, 32, 1) @ Wbb  ==  x @ sum_of_32_row_blocks(Wbb)
    wbb = params["wbb"].reshape(32, L, out_channels).sum(axis=0)     # (L, C)
    wbb = _pad2d(wbb, L, c_out_p).astype(jnp.bfloat16)
    bbb = _pad2d(params["bbb"], 1, c_out_p)
    w1 = _pad2d(params["w1"], c_out_p, c_out_p)
    wfc = _pad2d(params["wfc"], c_out_p, nc_p)
    whead = jnp.concatenate([w1, wfc], axis=1).astype(jnp.bfloat16)  # (Cp, Cp+NCp)
    b1 = _pad2d(params["b1"], 1, c_out_p)
    bfc = _pad2d(params["bfc"], 1, nc_p, fill=NEG_INF)   # padded classes -> -inf
    bhead = jnp.concatenate([b1, bfc], axis=1)
    w2 = _pad2d(params["w2"], c_out_p, dim_sub).astype(jnp.bfloat16)
    b2 = _pad2d(params["b2"], 1, dim_sub)
    return dict(wbb=wbb, bbb=bbb, whead=whead, bhead=bhead, w2=w2, b2=b2)


def encoder_dual_forward(prep_main, prep_ema, x_main, x_ema, *,
                         out_channels, num_classes, dim, block_b=256):
    """x_*: (B, L) raw signals. Returns (logits (2,B,NCp) f32, emb (2,B,dim_sub) bf16)."""
    B, L = x_main.shape
    c_out_p = _round_up(out_channels, LANES)
    nc_p = _round_up(num_classes, LANES)
    dim_sub = _round_up(dim, SUBLANES_BF16)
    block_b = min(block_b, _round_up(B, SUBLANES_BF16))
    b_pad = _round_up(B, block_b)

    def pad_x(x):
        return jnp.pad(x, ((0, b_pad - B), (0, 0))).astype(jnp.bfloat16)

    x_stack = jnp.stack([pad_x(x_main), pad_x(x_ema)], axis=0)        # (2, Bp, L)

    def stack(name):
        return jnp.stack([prep_main[name], prep_ema[name]], axis=0)

    args = (x_stack, stack("wbb"), stack("bbb"), stack("whead"),
            stack("bhead"), stack("w2"), stack("b2"))

    idx_b = lambda m, i: (m, i, 0)     # batch-blocked tensors
    idx_w = lambda m, i: (m, 0, 0)     # per-model resident weights

    # TODO(synk): on v7x mark the idx_w specs with pipeline_mode=pl.Buffered(1)
    # (they never change along the pipelined axis) to halve weight VMEM.
    logits, emb = pl.pallas_call(
        functools.partial(encoder_kernel, c_out_p=c_out_p),
        grid=(2, b_pad // block_b),
        in_specs=[
            pl.BlockSpec((None, block_b, L), idx_b),
            pl.BlockSpec((None, L, c_out_p), idx_w),
            pl.BlockSpec((None, 1, c_out_p), idx_w),
            pl.BlockSpec((None, c_out_p, c_out_p + nc_p), idx_w),
            pl.BlockSpec((None, 1, c_out_p + nc_p), idx_w),
            pl.BlockSpec((None, c_out_p, dim_sub), idx_w),
            pl.BlockSpec((None, 1, dim_sub), idx_w),
        ],
        out_specs=(pl.BlockSpec((None, block_b, nc_p), idx_b),
                   pl.BlockSpec((None, block_b, dim_sub), idx_b)),
        out_shape=(jax.ShapeDtypeStruct((2, b_pad, nc_p), jnp.float32),
                   jax.ShapeDtypeStruct((2, b_pad, dim_sub), jnp.bfloat16)),
        compiler_params=pltpu.CompilerParams(
            dimension_semantics=("parallel", "parallel"),
            vmem_limit_bytes=VMEM_LIMIT),
    )(*args)
    return logits[:, :B, :], emb[:, :B, :]


# ----------------------------------------------------------------------------
# Kernel 2: SimMatch unlabeled branch, K-tiled over the memory bank with
# online-softmax accumulators (flash-attention style).
#   teacher_prob ∝ exp(feat_ku@bank/tt) * prob_ku_orig[:, labels]
#   aggregated   = scatter_add(softmax(feat_ku@bank/tt)) by labels
#   prob_ku      = c*prob_orig + (1-c)*aggregated
#   loss_in      = logsumexp(s) - sum(teacher_prob * s),  s = feat_qu@bank/st
# gather / scatter_add over `labels` are bf16 one-hot matmuls built per K-tile.
# ----------------------------------------------------------------------------
def unlabel_kernel(feat_qu_ref, feat_ku_ref, logits_ku_ref, bank_ref, labels_ref,
                   prob_ku_ref, loss_ref, prob_sc, agg_sc, acc_sc,
                   *, inv_tt, inv_st, c_smooth, nc_p, block_b):
    k = pl.program_id(1)

    @pl.when(k == 0)
    def _init():
        zl = logits_ku_ref[...]
        zl = zl - jnp.max(zl, axis=-1, keepdims=True)
        e = jnp.exp(zl)
        prob_sc[...] = e / jnp.sum(e, axis=-1, keepdims=True)   # exact, once/block
        agg_sc[...] = jnp.zeros_like(agg_sc)
        # acc cols: 0=m_t, 1=l_t, 2=z, 3=x, 4=m_s, 5=l_s, 6/7 unused
        col = lax.broadcasted_iota(jnp.int32, acc_sc.shape, 1)
        acc_sc[...] = jnp.where((col == 0) | (col == 4), -jnp.inf, 0.0)

    labels = labels_ref[...]                                  # (1, TK) lane-major
    valid = labels >= 0
    bank = bank_ref[...]                                      # (dim_sub, TK) bf16

    # fused teacher + student similarity: one MXU weight push per bank tile
    feat2 = jnp.concatenate([feat_ku_ref[...], feat_qu_ref[...]], axis=0)
    ts = jnp.dot(feat2, bank, preferred_element_type=jnp.float32)   # (2TB, TK)
    t = jnp.where(valid, ts[:block_b] * inv_tt, NEG_INF)
    s = jnp.where(valid, ts[block_b:] * inv_st, NEG_INF)

    # gather / scatter_add over `labels` as bf16 one-hot matmuls
    onehot = (labels ==
              lax.broadcasted_iota(jnp.int32, (nc_p, labels.shape[1]), 0)
              ).astype(jnp.bfloat16)                          # (NCp, TK)
    factor = jnp.dot(prob_sc[...].astype(jnp.bfloat16), onehot,
                     preferred_element_type=jnp.float32)      # (TB, TK)

    acc = acc_sc[...]                                         # (TB, 8)
    m_t, l_t = acc[:, 0:1], acc[:, 1:2]
    z, x = acc[:, 2:3], acc[:, 3:4]
    m_s, l_s = acc[:, 4:5], acc[:, 5:6]

    # --- teacher online-softmax accumulators ---
    m_t_n = jnp.maximum(m_t, jnp.max(t, axis=-1, keepdims=True))
    alpha = jnp.exp(m_t - m_t_n)
    e_t = jnp.exp(t - m_t_n)
    u = e_t * factor
    l_t_n = alpha * l_t + jnp.sum(e_t, axis=-1, keepdims=True)
    z_n = alpha * z + jnp.sum(u, axis=-1, keepdims=True)
    x_n = alpha * x + jnp.sum(u * s, axis=-1, keepdims=True)
    agg_sc[...] = alpha * agg_sc[...] + lax.dot_general(
        e_t.astype(jnp.bfloat16), onehot, (((1,), (1,)), ((), ())),
        preferred_element_type=jnp.float32)                   # scatter_add as matmul

    # --- student log-sum-exp ---
    m_s_n = jnp.maximum(m_s, jnp.max(s, axis=-1, keepdims=True))
    alpha_s = jnp.exp(m_s - m_s_n)
    l_s_n = alpha_s * l_s + jnp.sum(jnp.exp(s - m_s_n), axis=-1, keepdims=True)

    acc_sc[...] = jnp.concatenate(
        [m_t_n, l_t_n, z_n, x_n, m_s_n, l_s_n, acc[:, 6:8]], axis=-1)

    @pl.when(k == pl.num_programs(1) - 1)
    def _finalize():
        a = acc_sc[...]
        aggregated = agg_sc[...] / a[:, 1:2]                  # exact, once/block
        prob_ku_ref[...] = prob_sc[...] * c_smooth + aggregated * (1.0 - c_smooth)
        # loss = -sum(teacher_prob * log_softmax(student)) = lse(s) - sum(u*s)/sum(u)
        lse_s = a[:, 4:5] + jnp.log(a[:, 5:6])
        loss = lse_s - a[:, 3:4] / (a[:, 2:3] + 1e-12)
        loss_ref[...] = jnp.broadcast_to(loss, loss_ref.shape)


def prepare_bank(bank, bank_labels, *, dim, block_k=BLOCK_K):
    """One-time conversion of the (dim, K) f32 bank into the persistent kernel
    layout: bf16, dim padded only to the bf16 sublane multiple (16), K padded
    to the K-tile; labels lane-major (1, Kp) int32 with -1 padding."""
    dim_sub = _round_up(dim, SUBLANES_BF16)
    K = bank.shape[1]
    k_p = _round_up(K, block_k)
    bank_p = jnp.pad(bank, ((0, dim_sub - bank.shape[0]), (0, k_p - K))
                     ).astype(jnp.bfloat16)
    labels_p = jnp.pad(bank_labels.astype(jnp.int32).reshape(1, K),
                       ((0, 0), (0, k_p - K)), constant_values=-1)
    return bank_p, labels_p


def simmatch_unlabel(feat_qu, feat_ku, logits_ku_p, bank_p, labels_p, *,
                     tt, st, c_smooth, num_classes,
                     block_b=256, block_k=BLOCK_K):
    bu = feat_qu.shape[0]
    dim_sub = bank_p.shape[0]
    nc_p = logits_ku_p.shape[1]
    k_p = bank_p.shape[1]
    assert k_p % block_k == 0
    block_b = min(block_b, _round_up(bu, SUBLANES_BF16))
    bu_p = _round_up(bu, block_b)

    fq = jnp.pad(feat_qu.astype(jnp.bfloat16), ((0, bu_p - bu), (0, 0)))
    fk = jnp.pad(feat_ku.astype(jnp.bfloat16), ((0, bu_p - bu), (0, 0)))
    lg = jnp.pad(logits_ku_p, ((0, bu_p - bu), (0, 0)))

    kern = functools.partial(unlabel_kernel, inv_tt=1.0 / tt, inv_st=1.0 / st,
                             c_smooth=c_smooth, nc_p=nc_p, block_b=block_b)
    prob_ku, loss = pl.pallas_call(
        kern,
        grid=(bu_p // block_b, k_p // block_k),
        in_specs=[
            pl.BlockSpec((block_b, dim_sub), lambda i, k: (i, 0)),
            pl.BlockSpec((block_b, dim_sub), lambda i, k: (i, 0)),
            pl.BlockSpec((block_b, nc_p), lambda i, k: (i, 0)),
            pl.BlockSpec((dim_sub, block_k), lambda i, k: (0, k)),
            pl.BlockSpec((1, block_k), lambda i, k: (0, k)),
        ],
        out_specs=(pl.BlockSpec((block_b, nc_p), lambda i, k: (i, 0)),
                   pl.BlockSpec((block_b, LANES), lambda i, k: (i, 0))),
        out_shape=(jax.ShapeDtypeStruct((bu_p, nc_p), jnp.float32),
                   jax.ShapeDtypeStruct((bu_p, LANES), jnp.float32)),
        scratch_shapes=[
            pltpu.VMEM((block_b, nc_p), jnp.float32),   # prob_ku_orig
            pltpu.VMEM((block_b, nc_p), jnp.float32),   # aggregated (unnormalized)
            pltpu.VMEM((block_b, 8), jnp.float32),      # m_t,l_t,z,x,m_s,l_s packed
        ],
        compiler_params=pltpu.CompilerParams(
            dimension_semantics=("parallel", "arbitrary"),
            vmem_limit_bytes=VMEM_LIMIT),
    )(fq, fk, lg, bank_p, labels_p)
    return prob_ku[:bu, :num_classes], loss[:bu, 0]


# ----------------------------------------------------------------------------
# SimMatch forward (functional: prepared bank buffers passed in / returned)
# ----------------------------------------------------------------------------
def simmatch_forward(main_params, ema_params, bank_p, labels_p,
                     im_x, im_u_w, im_u_s, labels, index, *,
                     num_classes, dim, start_unlabel=True,
                     tt=0.1, st=0.1, c_smooth=0.9):
    batch_x = im_x.shape[0]
    out_channels = main_params["wbb"].shape[1]
    L = main_params["wbb"].shape[0] // 32

    prep_main = prepare_encoder_params(main_params, L, out_channels,
                                       num_classes, dim)
    prep_ema = prepare_encoder_params(ema_params, L, out_channels,
                                      num_classes, dim)

    # student on cat(im_x, im_u_s), teacher (EMA, no_grad) on cat(im_x, im_u_w),
    # both fused into one pallas_call (grid axis 0 selects the parameter set).
    x_main = jnp.concatenate([im_x, im_u_s], axis=0)[:, 0, :]
    x_ema = jnp.concatenate([im_x, im_u_w], axis=0)[:, 0, :]
    logits2, emb2 = encoder_dual_forward(
        prep_main, prep_ema, x_main, x_ema,
        out_channels=out_channels, num_classes=num_classes, dim=dim)

    logits_q, feat_q = logits2[0], emb2[0]
    logits_k, feat_k = logits2[1], emb2[1]

    logits_qx = logits_q[:batch_x, :num_classes]
    logits_qu = logits_q[batch_x:, :num_classes]
    feat_qu = feat_q[batch_x:]                   # (Bu, dim_sub) bf16
    logits_ku_p = logits_k[batch_x:]             # padded classes hold -1e30
    feat_kx = feat_k[:batch_x]                   # (Bx, dim_sub) bf16
    feat_ku = feat_k[batch_x:]

    # TODO(synk): args.DA distribution_alignment needs torch.distributed
    # all_reduce + a persistent DA queue; omitted (DA=False path).

    if start_unlabel:
        prob_ku, loss_in = simmatch_unlabel(
            feat_qu, feat_ku, logits_ku_p, bank_p, labels_p,
            tt=tt, st=st, c_smooth=c_smooth, num_classes=num_classes)
    else:
        prob_ku = jax.nn.softmax(logits_ku_p[:, :num_classes], axis=-1)
        loss_in = jnp.zeros((), jnp.float32)

    # _update_bank (buffer update — pure glue; bank stays bf16 / pre-padded)
    new_bank = bank_p.at[:, index].set(feat_kx.T)
    lab = labels[..., 0] if labels.ndim > 1 else labels
    new_labels = labels_p.at[0, index].set(lab.astype(jnp.int32))

    return (logits_qx, prob_ku, logits_qu, loss_in), (new_bank, new_labels)


# ----------------------------------------------------------------------------
# Deterministic parameter construction
# ----------------------------------------------------------------------------
def init_params(key, in_dim, out_channels, num_classes, dim):
    ks = jax.random.split(key, 8)
    s = 0.05
    return {
        "wbb": jax.random.normal(ks[0], (in_dim, out_channels), jnp.float32) * s,
        "bbb": jax.random.normal(ks[1], (1, out_channels), jnp.float32) * s,
        "w1": jax.random.normal(ks[2], (out_channels, out_channels), jnp.float32) * s,
        "b1": jax.random.normal(ks[3], (1, out_channels), jnp.float32) * s,
        "w2": jax.random.normal(ks[4], (out_channels, dim), jnp.float32) * s,
        "b2": jax.random.normal(ks[5], (1, dim), jnp.float32) * s,
        "wfc": jax.random.normal(ks[6], (out_channels, num_classes), jnp.float32) * s,
        "bfc": jax.random.normal(ks[7], (1, num_classes), jnp.float32) * s,
    }


# ----------------------------------------------------------------------------
# Pure-JAX reference (same bf16-cast operands, full-K softmax — no online trick)
# ----------------------------------------------------------------------------
def _forward_reference(main_params, ema_params, bank, bank_labels,
                       im_x, im_u_w, im_u_s, *, num_classes, dim,
                       tt, st, c_smooth):
    out_channels = main_params["wbb"].shape[1]
    L = main_params["wbb"].shape[0] // 32
    c_out_p = _round_up(out_channels, LANES)
    dim_sub = _round_up(dim, SUBLANES_BF16)

    def enc(params, x):
        p = prepare_encoder_params(params, L, out_channels, num_classes, dim)
        f32 = lambda a: a.astype(jnp.float32)
        xb = x.astype(jnp.bfloat16).astype(jnp.float32)
        feat = jax.nn.relu(xb @ f32(p["wbb"]) + p["bbb"])
        z = feat.astype(jnp.bfloat16).astype(jnp.float32) @ f32(p["whead"]) + p["bhead"]
        h = jax.nn.relu(z[:, :c_out_p])
        logits = z[:, c_out_p:]
        emb = h.astype(jnp.bfloat16).astype(jnp.float32) @ f32(p["w2"]) + p["b2"]
        emb = emb * lax.rsqrt(jnp.maximum(jnp.sum(emb * emb, -1, keepdims=True), 1e-24))
        return logits, emb

    batch_x = im_x.shape[0]
    x_main = jnp.concatenate([im_x, im_u_s], 0)[:, 0, :]
    x_ema = jnp.concatenate([im_x, im_u_w], 0)[:, 0, :]
    logits_q, feat_q = enc(main_params, x_main)
    logits_k, feat_k = enc(ema_params, x_ema)

    feat_qu = feat_q[batch_x:]
    feat_ku = feat_k[batch_x:]
    logits_ku_p = logits_k[batch_x:]
    nc_p = logits_ku_p.shape[1]

    fq = feat_qu.astype(jnp.bfloat16).astype(jnp.float32)
    fk = feat_ku.astype(jnp.bfloat16).astype(jnp.float32)
    bank_b = jnp.pad(bank, ((0, dim_sub - bank.shape[0]), (0, 0))
                     ).astype(jnp.bfloat16).astype(jnp.float32)

    prob_orig = jax.nn.softmax(logits_ku_p, axis=-1)
    t = (fk @ bank_b) / tt
    s = (fq @ bank_b) / st
    tp_orig = jax.nn.softmax(t, axis=-1)
    onehot = (bank_labels[None, :] == jnp.arange(nc_p)[:, None]).astype(jnp.float32)
    factor = prob_orig @ onehot
    tp = tp_orig * factor
    tp = tp / (jnp.sum(tp, axis=1, keepdims=True) + 1e-12)
    log_sp = jax.nn.log_softmax(s, axis=-1)
    loss = jnp.sum(-tp * log_sp, axis=1)
    agg = tp_orig @ onehot.T
    prob_ku = prob_orig * c_smooth + agg * (1.0 - c_smooth)
    return (logits_q[:batch_x, :num_classes], prob_ku[:, :num_classes],
            logits_q[batch_x:, :num_classes], loss)


if __name__ == "__main__":
    batch_x, batch_u = 2, 2
    L = 16                      # signal length; input is (B, 1, L), repeated x32
    in_dim = 32 * L
    out_channels = 32
    num_classes = 32
    dim = 16
    K = 768                     # memory-bank size: 2 K-tiles of 512, one half-padded

    key = jax.random.PRNGKey(0)
    k_par, k_bank, k_x, k_uw, k_us, k_lab, k_bl = jax.random.split(key, 7)

    main_params = init_params(k_par, in_dim, out_channels, num_classes, dim)
    # TODO(synk): EMA momentum update / eman copy are training-time ops; the
    # teacher here is just a parameter copy (matches the PyTorch constructor).
    ema_params = jax.tree_util.tree_map(lambda p: p, main_params)

    bank = jax.random.normal(k_bank, (dim, K), jnp.float32)
    bank = bank / jnp.linalg.norm(bank, axis=0, keepdims=True)     # normalize dim=0
    bank_labels = jax.random.randint(k_bl, (K,), 0, num_classes, jnp.int32)
    bank_p, labels_p = prepare_bank(bank, bank_labels, dim=dim)    # persistent layout

    im_x = jax.random.normal(k_x, (batch_x, 1, L), jnp.float32)
    im_u_w = jax.random.normal(k_uw, (batch_u, 1, L), jnp.float32)
    im_u_s = jax.random.normal(k_us, (batch_u, 1, L), jnp.float32)
    labels = jax.random.randint(k_lab, (batch_x, 1), 0, num_classes, jnp.int32)
    index = jnp.arange(batch_x, dtype=jnp.int32)

    (logits_qx, prob_ku, logits_qu, loss_in), (new_bank, new_labels) = \
        simmatch_forward(main_params, ema_params, bank_p, labels_p,
                         im_x, im_u_w, im_u_s, labels, index,
                         num_classes=num_classes, dim=dim,
                         start_unlabel=True, tt=0.1, st=0.1, c_smooth=0.9)
    jax.block_until_ready((logits_qx, prob_ku, logits_qu, loss_in,
                           new_bank, new_labels))

    # shape / sanity checks
    assert logits_qx.shape == (batch_x, num_classes)
    assert prob_ku.shape == (batch_u, num_classes)
    assert logits_qu.shape == (batch_u, num_classes)
    assert loss_in.shape == (batch_u,)
    assert new_bank.shape == bank_p.shape and new_bank.dtype == jnp.bfloat16
    assert bool(jnp.all(jnp.isfinite(loss_in)))
    assert bool(jnp.allclose(jnp.sum(prob_ku, axis=-1), 1.0, atol=1e-2))

    # cross-check kernels against a direct (non-online-softmax) reference
    ref_qx, ref_pku, ref_qu, ref_loss = _forward_reference(
        main_params, ema_params, bank, bank_labels, im_x, im_u_w, im_u_s,
        num_classes=num_classes, dim=dim, tt=0.1, st=0.1, c_smooth=0.9)
    assert bool(jnp.allclose(logits_qx, ref_qx, atol=2e-2, rtol=2e-2))
    assert bool(jnp.allclose(logits_qu, ref_qu, atol=2e-2, rtol=2e-2))
    assert bool(jnp.allclose(prob_ku, ref_pku, atol=5e-2, rtol=5e-2))
    assert bool(jnp.allclose(loss_in, ref_loss, atol=5e-2, rtol=5e-2))

    print("KERNEL_OK")
</pallas_src>

<mosaic_0001>
module attributes {stable_mosaic.version = 11 : i64} {
  func.func @encoder_kernel(%arg0: i32, %arg1: i32, %arg2: memref<1x16x16xbf16, #tpu.memory_space<vmem>>, %arg3: memref<1x16x128xbf16, #tpu.memory_space<vmem>>, %arg4: memref<1x1x128xf32, #tpu.memory_space<vmem>>, %arg5: memref<1x128x256xbf16, #tpu.memory_space<vmem>>, %arg6: memref<1x1x256xf32, #tpu.memory_space<vmem>>, %arg7: memref<1x128x16xbf16, #tpu.memory_space<vmem>>, %arg8: memref<1x1x16xf32, #tpu.memory_space<vmem>>, %arg9: memref<1x16x128xf32, #tpu.memory_space<vmem>>, %arg10: memref<1x16x16xbf16, #tpu.memory_space<vmem>>) attributes {dimension_semantics = [#tpu.dimension_semantics<parallel>, #tpu.dimension_semantics<parallel>], iteration_bounds = array<i64: 2, 1>, scalar_prefetch = 0 : i64, scratch_operands = 0 : i64, tpu.core_type = #tpu.core_type<tc>, window_params = [{transform_indices = @transform_0, window_bounds = array<i64: 1, 16, 16>}, {transform_indices = @transform_1, window_bounds = array<i64: 1, 16, 128>}, {transform_indices = @transform_2, window_bounds = array<i64: 1, 1, 128>}, {transform_indices = @transform_3, window_bounds = array<i64: 1, 128, 256>}, {transform_indices = @transform_4, window_bounds = array<i64: 1, 1, 256>}, {transform_indices = @transform_5, window_bounds = array<i64: 1, 128, 16>}, {transform_indices = @transform_6, window_bounds = array<i64: 1, 1, 16>}, {transform_indices = @transform_7, window_bounds = array<i64: 1, 16, 128>}, {transform_indices = @transform_8, window_bounds = array<i64: 1, 16, 16>}]} {
    %c0 = arith.constant 0 : index
    %c0_0 = arith.constant 0 : index
    %c0_1 = arith.constant 0 : index
    %0 = vector.load %arg2[%c0, %c0_0, %c0_1] : memref<1x16x16xbf16, #tpu.memory_space<vmem>>, vector<1x16x16xbf16>
    %1 = vector.shape_cast %0 : vector<1x16x16xbf16> to vector<16x16xbf16>
    %c0_2 = arith.constant 0 : index
    %c0_3 = arith.constant 0 : index
    %c0_4 = arith.constant 0 : index
    %2 = vector.load %arg3[%c0_2, %c0_3, %c0_4] : memref<1x16x128xbf16, #tpu.memory_space<vmem>>, vector<1x16x128xbf16>
    %3 = vector.shape_cast %2 : vector<1x16x128xbf16> to vector<16x128xbf16>
    %cst = arith.constant dense<0.000000e+00> : vector<16x128xf32>
    %4 = tpu.matmul %1, %3, %cst {dimension_numbers = #tpu.dot_dimension_numbers<[1], [0], [0], [1], [0, 0, 1, 1], [], []>} : vector<16x16xbf16>, vector<16x128xbf16>, vector<16x128xf32> -> vector<16x128xf32>
    %c0_5 = arith.constant 0 : index
    %c0_6 = arith.constant 0 : index
    %c0_7 = arith.constant 0 : index
    %5 = vector.load %arg4[%c0_5, %c0_6, %c0_7] : memref<1x1x128xf32, #tpu.memory_space<vmem>>, vector<1x1x128xf32>
    %6 = vector.shape_cast %5 : vector<1x1x128xf32> to vector<1x128xf32>
    %7 = vector.broadcast %6 : vector<1x128xf32> to vector<16x128xf32>
    %8 = arith.addf %4, %7 : vector<16x128xf32>
    %cst_8 = arith.constant 0.000000e+00 : f32
    %9 = vector.broadcast %cst_8 : f32 to vector<16x128xf32>
    %10 = arith.maximumf %8, %9 : vector<16x128xf32>
    %11 = arith.truncf %10 : vector<16x128xf32> to vector<16x128xbf16>
    %c0_9 = arith.constant 0 : index
    %c0_10 = arith.constant 0 : index
    %c0_11 = arith.constant 0 : index
    %12 = vector.load %arg5[%c0_9, %c0_10, %c0_11] : memref<1x128x256xbf16, #tpu.memory_space<vmem>>, vector<1x128x256xbf16>
    %13 = vector.shape_cast %12 : vector<1x128x256xbf16> to vector<128x256xbf16>
    %cst_12 = arith.constant dense<0.000000e+00> : vector<16x256xf32>
    %14 = tpu.matmul %11, %13, %cst_12 {dimension_numbers = #tpu.dot_dimension_numbers<[1], [0], [0], [1], [0, 0, 1, 1], [], []>} : vector<16x128xbf16>, vector<128x256xbf16>, vector<16x256xf32> -> vector<16x256xf32>
    %c0_13 = arith.constant 0 : index
    %c0_14 = arith.constant 0 : index
    %c0_15 = arith.constant 0 : index
    %15 = vector.load %arg6[%c0_13, %c0_14, %c0_15] : memref<1x1x256xf32, #tpu.memory_space<vmem>>, vector<1x1x256xf32>
    %16 = vector.shape_cast %15 : vector<1x1x256xf32> to vector<1x256xf32>
    %17 = vector.broadcast %16 : vector<1x256xf32> to vector<16x256xf32>
    %18 = arith.addf %14, %17 : vector<16x256xf32>
    %19 = vector.extract_strided_slice %18 {offsets = [0, 0], sizes = [16, 128], strides = [1, 1]} : vector<16x256xf32> to vector<16x128xf32>
    %cst_16 = arith.constant 0.000000e+00 : f32
    %20 = vector.broadcast %cst_16 : f32 to vector<16x128xf32>
    %21 = arith.maximumf %19, %20 : vector<16x128xf32>
    %22 = vector.extract_strided_slice %18 {offsets = [0, 128], sizes = [16, 128], strides = [1, 1]} : vector<16x256xf32> to vector<16x128xf32>
    %c0_17 = arith.constant 0 : index
    %c0_18 = arith.constant 0 : index
    %c0_19 = arith.constant 0 : index
    %23 = vector.load %arg9[%c0_17, %c0_18, %c0_19] : memref<1x16x128xf32, #tpu.memory_space<vmem>>, vector<1x16x128xf32>
    %24 = vector.shape_cast %23 : vector<1x16x128xf32> to vector<16x128xf32>
    %25 = vector.shape_cast %22 : vector<16x128xf32> to vector<1x16x128xf32>
    tpu.vector_store %arg9[%c0_17, %c0_18, %c0_19], %25 {strides = array<i32>} : memref<1x16x128xf32, #tpu.memory_space<vmem>>, vector<1x16x128xf32>,
    %26 = arith.truncf %21 : vector<16x128xf32> to vector<16x128xbf16>
    %c0_20 = arith.constant 0 : index
    %c0_21 = arith.constant 0 : index
    %c0_22 = arith.constant 0 : index
    %27 = vector.load %arg7[%c0_20, %c0_21, %c0_22] : memref<1x128x16xbf16, #tpu.memory_space<vmem>>, vector<1x128x16xbf16>
    %28 = vector.shape_cast %27 : vector<1x128x16xbf16> to vector<128x16xbf16>
    %cst_23 = arith.constant dense<0.000000e+00> : vector<16x16xf32>
    %29 = tpu.matmul %26, %28, %cst_23 {dimension_numbers = #tpu.dot_dimension_numbers<[1], [0], [0], [1], [0, 0, 1, 1], [], []>} : vector<16x128xbf16>, vector<128x16xbf16>, vector<16x16xf32> -> vector<16x16xf32>
    %c0_24 = arith.constant 0 : index
    %c0_25 = arith.constant 0 : index
    %c0_26 = arith.constant 0 : index
    %30 = vector.load %arg8[%c0_24, %c0_25, %c0_26] : memref<1x1x16xf32, #tpu.memory_space<vmem>>, vector<1x1x16xf32>
    %31 = vector.shape_cast %30 : vector<1x1x16xf32> to vector<1x16xf32>
    %32 = vector.broadcast %31 : vector<1x16xf32> to vector<16x16xf32>
    %33 = arith.addf %29, %32 : vector<16x16xf32>
    %34 = arith.mulf %33, %33 : vector<16x16xf32>
    %cst_27 = arith.constant dense<0.000000e+00> : vector<16xf32>
    %35 = vector.multi_reduction <add>, %34, %cst_27 [1] : vector<16x16xf32> to vector<16xf32>
    %36 = vector.shape_cast %35 : vector<16xf32> to vector<16x1xf32>
    %cst_28 = arith.constant 1.000000e-24 : f32
    %37 = vector.broadcast %cst_28 : f32 to vector<16x1xf32>
    %38 = arith.maximumf %36, %37 : vector<16x1xf32>
    %39 = math.rsqrt %38 : vector<16x1xf32>
    %40 = vector.broadcast %39 : vector<16x1xf32> to vector<16x16xf32>
    %41 = arith.mulf %33, %40 : vector<16x16xf32>
    %42 = arith.truncf %41 : vector<16x16xf32> to vector<16x16xbf16>
    %c0_29 = arith.constant 0 : index
    %c0_30 = arith.constant 0 : index
    %c0_31 = arith.constant 0 : index
    %43 = vector.load %arg10[%c0_29, %c0_30, %c0_31] : memref<1x16x16xbf16, #tpu.memory_space<vmem>>, vector<1x16x16xbf16>
    %44 = vector.shape_cast %43 : vector<1x16x16xbf16> to vector<16x16xbf16>
    %45 = vector.shape_cast %42 : vector<16x16xbf16> to vector<1x16x16xbf16>
    tpu.vector_store %arg10[%c0_29, %c0_30, %c0_31], %45 {strides = array<i32>} : memref<1x16x16xbf16, #tpu.memory_space<vmem>>, vector<1x16x16xbf16>,
    return
  }
  func.func @transform_0(%arg0: i32, %arg1: i32) -> (i32, i32, i32) {
    %c0_i32 = arith.constant 0 : i32
    %c0_i32_0 = arith.constant 0 : i32
    return %arg0, %arg1, %c0_i32 : i32, i32, i32
  }
  func.func @transform_1(%arg0: i32, %arg1: i32) -> (i32, i32, i32) {
    %c0_i32 = arith.constant 0 : i32
    %c0_i32_0 = arith.constant 0 : i32
    %c0_i32_1 = arith.constant 0 : i32
    return %arg0, %c0_i32, %c0_i32_0 : i32, i32, i32
  }
  func.func @transform_2(%arg0: i32, %arg1: i32) -> (i32, i32, i32) {
    %c0_i32 = arith.constant 0 : i32
    %c0_i32_0 = arith.constant 0 : i32
    %c0_i32_1 = arith.constant 0 : i32
    return %arg0, %c0_i32, %c0_i32_0 : i32, i32, i32
  }
  func.func @transform_3(%arg0: i32, %arg1: i32) -> (i32, i32, i32) {
    %c0_i32 = arith.constant 0 : i32
    %c0_i32_0 = arith.constant 0 : i32
    %c0_i32_1 = arith.constant 0 : i32
    return %arg0, %c0_i32, %c0_i32_0 : i32, i32, i32
  }
  func.func @transform_4(%arg0: i32, %arg1: i32) -> (i32, i32, i32) {
    %c0_i32 = arith.constant 0 : i32
    %c0_i32_0 = arith.constant 0 : i32
    %c0_i32_1 = arith.constant 0 : i32
    return %arg0, %c0_i32, %c0_i32_0 : i32, i32, i32
  }
  func.func @transform_5(%arg0: i32, %arg1: i32) -> (i32, i32, i32) {
    %c0_i32 = arith.constant 0 : i32
    %c0_i32_0 = arith.constant 0 : i32
    %c0_i32_1 = arith.constant 0 : i32
    return %arg0, %c0_i32, %c0_i32_0 : i32, i32, i32
  }
  func.func @transform_6(%arg0: i32, %arg1: i32) -> (i32, i32, i32) {
    %c0_i32 = arith.constant 0 : i32
    %c0_i32_0 = arith.constant 0 : i32
    %c0_i32_1 = arith.constant 0 : i32
    return %arg0, %c0_i32, %c0_i32_0 : i32, i32, i32
  }
  func.func @transform_7(%arg0: i32, %arg1: i32) -> (i32, i32, i32) {
    %c0_i32 = arith.constant 0 : i32
    %c0_i32_0 = arith.constant 0 : i32
    return %arg0, %arg1, %c0_i32 : i32, i32, i32
  }
  func.func @transform_8(%arg0: i32, %arg1: i32) -> (i32, i32, i32) {
    %c0_i32 = arith.constant 0 : i32
    %c0_i32_0 = arith.constant 0 : i32
    return %arg0, %arg1, %c0_i32 : i32, i32, i32
  }
}

</mosaic_0001>

<bundles_post_ra>
// kernel: tpu_custom_call.1
= control target key start
LH: loop header
LB: loop body
LE: loop exit
PB: predicated region body
PF: predicated region fallthrough
CT: control target
= control target key end

     0   :  { %14 = vsyncpa [#allocation3], 0  ;;  %s1731_s0 = inlined_call_operand.vmem [shape: bf16[2,16,16], index: 0, kind: input, shape index: {}]   ;;  %s1732_s1 = inlined_call_operand.vmem [shape: bf16[2,16,128], index: 1, kind: input, shape index: {}]   ;;  %s1733_s2 = inlined_call_operand.vmem [shape: f32[2,1,128], index: 2, kind: input, shape index: {}]   ;;  %s1734_s3 = inlined_call_operand.hbm [shape: bf16[2,128,256], index: 3, kind: input, shape index: {}]   ;;  %s1735_s4 = inlined_call_operand.vmem [shape: f32[2,1,256], index: 4, kind: input, shape index: {}]   ;;  %s1736_s5 = inlined_call_operand.vmem [shape: bf16[2,128,16], index: 5, kind: input, shape index: {}]   ;;  %s1737_s6 = inlined_call_operand.vmem [shape: f32[2,1,16], index: 6, kind: input, shape index: {}]   ;;  %s1738_s7 = inlined_call_operand.hbm [shape: f32[2,16,128], index: 7, kind: output, shape index: {0}]   ;;  %s1739_s8 = inlined_call_operand.hbm [shape: bf16[2,16,16], index: 8, kind: output, shape index: {1}]  }
   0x1   :  { %16 = vsyncpa [#allocation3 + $0x1], 0 }
   0x2   :  { %17 = vsyncpa [#allocation4], 0 }
   0x3   :  { %19 = vsyncpa [#allocation4 + $0x1], 0 }
   0x4   :  { %20 = vsyncpa [#allocation7], 0 }
   0x5   :  { %22 = vsyncpa [#allocation7 + $0x1], 0  ;;  %s1481_s27 = smov 0   ;;  %s1483_s28 = smov 0  }
   0x6   :  { %s1485_s29 = smov 0   ;;  %s1487_s30 = smov 0  }
   0x7   :  { %s1489_s9 = smov 0   ;;  %s1491_s10 = smov 0  }
   0x8 LB: > { %1742 = sst [smem:[#allocation11_spill]] %s1418_s9  ;;  %s1068_s11 = sadd.s32 4294967295, %s1422_s10   ;;  %s1422_s10 = sphi %s1491_s10, %s28_s10   ;;  %s1418_s9 = sphi %s1489_s9, %s1751_s9   ;;  %s1414_s30 = sphi %s1487_s30, %s1750_s30   ;;  %s1410_s29 = sphi %s1485_s29, %s1754_s29   ;;  %s1406_s28 = sphi %s1483_s28, %s1753_s28   ;;  %s1402_s27 = sphi %s1481_s27, %s1752_s27  }
   0x9   : > { %s1069_s12 = sadd.s32 4294967294, %s1422_s10   ;;  %s40_s13 = sadd.s32 1, %s1418_s9 }
   0xa   : > { %s127_s14 = sadd.s32 1, %s1410_s29  ;;  %p42_p0 = scmp.ge.s32.totalorder %s40_s13, 2 }
   0xb   : > { %p134_p1 = scmp.ne.s32.totalorder %s1410_s29, %s1406_s28  ;;  %p135_p2 = scmp.eq.s32.totalorder %s1422_s10, 0 }
   0xc   : > { %p140_p3 = scmp.ne.s32.totalorder %s1406_s28, %s1402_s27  ;;  %s1756_s13 = smov (%p42_p0, %s40_s13), 0 }
   0xd   : > { %1743 = sst [smem:[#allocation12_spill]] %s1756_s13  ;;  %p1522_p4 = por %p135_p2, %p134_p1 }
   0xe   : > { %p141_p5 = scmp.eq.s32.totalorder %s1068_s11, 0  ;;  %s124_s16 = ssub.s32 %s1418_s9, %s1756_s13 }
   0xf   : > { %p244_p6 = scmp.eq.s32.totalorder %s1068_s11, 1  ;;  %p125_p7 = scmp.eq.s32.totalorder %s124_s16, 0 }
  0x10   : > { %p1528_p8 = por %p141_p5, %p140_p3  ;;  %p250_p10 = scmp.eq.s32.totalorder %s1069_s12, 1 }
  0x11   : > { %p1532_p9 = por %p244_p6, %p134_p1  ;;  %p1187_p13 = scmp.lt.s32.totalorder %s1422_s10, 2 }
  0x12   : > { %s1537_s19 = scalar_select %p125_p7, %s1410_s29, %s127_s14  }
  0x13   : > { %p1539_p11 = por %p250_p10, %p140_p3  ;;  %s325_s21 = sand.u32 1, %s1410_s29  }
  0x14   : > { %s1072_s22 = sshll.u32 %s325_s21, 7  ;;  %s1125_s23 = sshll.u32 %s1418_s9, 11 }
  0x15   : > { %s335_s26 = scalar_lea.hbm %s1734_s3, %s1125_s23  ;;  %s329_s11 = scalar_lea.vmem [#allocation2], %s1072_s22 }
  0x16   : > { %s336_s16 = sshll.u32 %s329_s11, 4  ;;  %p1552_p0 = pnand %p1187_p13, %p1522_p4  ;;  %s337_s16 = int_to_ptr.vmem [resolvable:$true] %s336_s16 }
  0x17   : > { %p1075_p1 = scmp.ge.s32.totalorder %s1422_s10, 1  ;;  %s326_s14 = scalar_lea.sflag [#allocation3], %s325_s21 }
  0x18   : > { %p1286_p2 = pneg %p1552_p0  ;;  %s1297_s13 = scalar_lea.vmem %s337_s16, 2048 }
  0x19   : > { %p1298_p3 = scmp.ne.s32.totalorder %s337_s16, %s1297_s13  ;;  %s1424_s9 = smov [#allocation2]  }
  0x1a   : > { %s1302_s24 = sshll.u32 %s1424_s9, 4  ;;  %s1303_s24 = int_to_ptr.vmem [resolvable:$false] %s1302_s24 }
  0x1b   : > { %p1300_p5 = pnand %p1298_p3, %p1286_p2  ;;  %s1304_s22 = scalar_lea.vmem %s1303_s24, 4096 }
  0x1c   : > { %p1305_p7 = scmp.lt.s32.totalorder %s337_s16, %s1303_s24  ;;  %p1306_p10 = scmp.lt.s32.totalorder %s1304_s22, %s1297_s13 }
  0x1d   : > { %p1301_p6 = pneg %p1300_p5 }
  0x1e   : > { %p1307_p12 = por %p1306_p10, %p1305_p7 }
  0x20   : > { %p1308_p4 = pnand %p1307_p12, %p1301_p6 }
  0x22   : > { %1311 = shalt.err (!%p1308_p4)
}
  0x23   : > { %s1425_s15 = smov 128   ;;  %s1426_s21 = smov 8  }
  0x24   : > { %1179 = dma.hbm_to_vmem [thread:$0]  (!%p1552_p0), %s335_s26, 2048, %s337_s16, %s326_s14, %s1425_s15, %s1425_s15, %s1426_s21  }
  0x25   : > { %p365_p13 = scmp.lt.s32.totalorder %s1422_s10, 3 }
  0x27   : > { %p366_p2 = pnand %p1075_p1, %p365_p13 }
  0x28   : > { %s1565_s9 = sand.u32 (!%p366_p2), 1, %s1406_s28  }
  0x29   : > { %369 = sbr.rel (%p366_p2) target bundleno = 837 (0x345), region = 48  ;;  %s1076_s13 = sshll.u32 (!%p366_p2), %s1565_s9, 7 }
  0x2a   : > { %s372_s23 = scalar_lea.sflag (!%p366_p2), [#allocation3], %s1565_s9  ;;  %s1569_s25 = scalar_lea.vmem (!%p366_p2), [#allocation2], %s1076_s13 }
  0x2e   : > { %1389 = dma.done.wait (%p1528_p8), %s372_s23, 2048  }
  0x2f   : > { %1391 = vsyncadd (%p1528_p8), %s372_s23, 4294965248  ;;  %p443_p12 = scmp.lt.s32.totalorder %s1414_s30, 1  ;;  %v1427_v0 = vmov 0.0   ;;  %vm1428_vm0 = vmmov 0   ;;  %v1248_v3 = vld [vmem:[%s1569_s25 + $0x74] ss:$8 sps:$4 sm:$0xff]   ;;  %v563_v38 = vlaneseq }
  0x30   : > { %1144 = vmatprep.subr.bf16.mxu0 %v1427_v0  ;;  %1146 = vmatprep.mubr.msk.bf16.mxu0 %vm1428_vm0, %v1427_v0  ;;  %vm497_vm1 = vcmask 130048   ;;  %v1250_v4 = vld [vmem:[%s1569_s25 + $0x70] ss:$8 sps:$4 sm:$0xff]   ;;  %v1251_v5 = vld [vmem:[%s1569_s25 + $0x64] ss:$8 sps:$4 sm:$0xff]   ;;  %v1429_v19 = vmov 0  }
  0x31   : > { %s1580_s26 = scalar_select %p443_p12, %s1414_s30, 1  ;;  %653 = vmatprep.subr.bf16.mxu1 %v1248_v3  ;;  %v1253_v6 = vld [vmem:[%s1569_s25 + $0x60] ss:$8 sps:$4 sm:$0xff]   ;;  %v1254_v7 = vld [vmem:[%s1569_s25 + $0x54] ss:$8 sps:$4 sm:$0xff]   ;;  %685 = vmatprep.mubr.bf16.mxu1 %v1429_v19  ;;  %v564_v39 = vshrl.u32 %v563_v38, 7 }
  0x32   : > { %654 = vmatpush1.bf16.msra.mxu1 %v1250_v4  ;;  %v1256_v8 = vld [vmem:[%s1569_s25 + $0x50] ss:$8 sps:$4 sm:$0xff]   ;;  %v1257_v9 = vld [vmem:[%s1569_s25 + $0x44] ss:$8 sps:$4 sm:$0xff]   ;;  %v1259_v10 = vld [vmem:[%s1569_s25 + $0x40] ss:$8 sps:$4 sm:$0xff]  }
  0x33   : > { %s1126_s11 = sshll.u32 %s1580_s26, 3  ;;  %655 = vmatprep.subr.bf16.mxu1 %v1251_v5  ;;  %s1128_s15 = sshll.u32 %s1580_s26, 6  ;;  %v1260_v11 = vld [vmem:[%s1569_s25 + $0x34] ss:$8 sps:$4 sm:$0xff]   ;;  %v1262_v12 = vld [vmem:[%s1569_s25 + $0x30] ss:$8 sps:$4 sm:$0xff]  }
  0x34   : > { %s450_s12 = scalar_lea.vmem %s1731_s0, %s1126_s11  ;;  %s456_s22 = scalar_lea.vmem %s1732_s1, %s1126_s11  ;;  %v1263_v13 = vld [vmem:[%s1569_s25 + $0x24] ss:$8 sps:$4 sm:$0xff]   ;;  %v1265_v14 = vld [vmem:[%s1569_s25 + $0x20] ss:$8 sps:$4 sm:$0xff]   ;;  %v1266_v15 = vld [vmem:[%s1569_s25 + $0x14] ss:$8 sps:$4 sm:$0xff]  }
  0x35   : > { %v1246_v1 = vld [vmem:[%s456_s22] sm:$0xff]   ;;  %s1604_s23 = scalar_lea.vmem %s1736_s5, %s1128_s15  ;;  %v1268_v16 = vld [vmem:[%s1569_s25 + $0x10] ss:$8 sps:$4 sm:$0xff]   ;;  %s459_s17 = scalar_lea.vmem %s1733_s2, %s1580_s26  ;;  %v565_v40 = vsub.s32 0, %v564_v39  ;;  %v569_v41 = vsub.s32 1, %v564_v39 }
  0x36   : > { %v1247_v2 = vld [vmem:[%s450_s12] sm:$0xff]   ;;  %1145 = vmatpush3.bf16.msra.mxu0 %v1246_v1  ;;  %656 = vmatpush1.bf16.msra.mxu1 %v1253_v6  ;;  %v1272_v20 = vld [vmem:[%s1604_s23 + $0x38] sm:$0xff]   ;;  %v1273_v21 = vld [vmem:[%s1604_s23 + $0x30] sm:$0xff]   ;;  %s1083_s16 = sshll.u32 %s1580_s26, 1  ;;  %s1077_s22 = sshll.u32 %s1565_s9, 4 }
  0x37   : > { %1150 = vmatprep.subr.bf16.mxu0 %v1427_v0  ;;  %657 = vmatprep.subr.bf16.mxu1 %v1254_v7  ;;  %v1269_v17 = vld [vmem:[%s1569_s25 + $0x4] ss:$8 sps:$4 sm:$0xff]   ;;  %v1271_v18 = vld [vmem:[%s1569_s25] ss:$8 sps:$4 sm:$0xff]   ;;  %v1276_v24 = vld [vmem:[%s1604_s23 + $0x18] sm:$0xff]   ;;  %s463_s24 = scalar_lea.vmem %s1735_s4, %s1083_s16  ;;  %s434_s15 = scalar_lea.vmem [#allocation5], %s1077_s22 }
  0x38   : > { %v1274_v22 = vld [vmem:[%s1604_s23 + $0x28] sm:$0xff]   ;;  %v1275_v23 = vld [vmem:[%s1604_s23 + $0x20] sm:$0xff]   ;;  %v1277_v35 = vld [vmem:[%s1604_s23 + $0x10] sm:$0xff]   ;;  %s859_s25 = sshll.u32 %s434_s15, 4  ;;  %s839_s12 = scalar_lea.sflag [#allocation4], %s1565_s9  ;;  %s1645_s25 = int_to_ptr.vmem [resolvable:$true] %s859_s25 }
  0x39   : > { %1147 = vmatmul.mubr.msk.bf16.vlgmr.msra.gmra.mxu0 %vm497_vm1, %v1247_v2  ;;  %v1086_v25 = vld [vmem:[%s459_s17] ss:$0 sm:$0xff]  ;;  %v1278_v36 = vld [vmem:[%s1604_s23 + $0x8] sm:$0xff]   ;;  %s1312_s14 = scalar_lea.vmem %s1645_s25, 256 }
  0x3a   : > { %1166 = vmatprep.mubr.msk.bf16.mxu0 %vm1428_vm0, %v1427_v0  ;;  %658 = vmatpush1.bf16.msra.mxu1 %v1256_v8  ;;  %v1279_v37 = vld [vmem:[%s1604_s23] sm:$0xff]   ;;  %s471_s23 = scalar_lea.vmem %s1737_s6, %s1580_s26  ;;  %s1131_s26 = sshll.u32 %s1414_s30, 8 }
  0x3b   : > { %659 = vmatprep.subr.bf16.mxu1 %v1257_v9  ;;  %1151 = vmatpush3.bf16.msra.mxu0 %v1272_v20  ;;  %v561_v42 = vld [vmem:[%s463_s24] sm:$0x3]  ;;  %s1651_s16 = scalar_lea.hbm %s1738_s7, %s1131_s26  ;;  %p1313_p8 = scmp.ne.s32.totalorder %s1645_s25, %s1312_s14 }
  0x3c   : > { %1152 = vmatprep.subr.bf16.mxu0 %v1427_v0  ;;  %v566_v43 = vrot.slane %v561_v42, %v565_v40  ;;  %v570_v44 = vrot.slane %v561_v42, %v569_v41  ;;  %v1106_v56 = vld [vmem:[%s471_s23] ss:$0 sm:$0xff]  ;;  %s1430_s24 = smov [#allocation5]  }
  0x3d   : > { %p1314_p0 = pnand %p1313_p8, %p1532_p9  ;;  %s1316_s22 = sshll.u32 %s1430_s24, 4  ;;  %s1317_s22 = int_to_ptr.vmem [resolvable:$false] %s1316_s22 }
  0x3e   : > { %660 = vmatpush1.bf16.msra.mxu1 %v1259_v10  ;;  %p1319_p3 = scmp.lt.s32.totalorder %s1645_s25, %s1317_s22 }
  0x3f   : > { %661 = vmatprep.subr.bf16.mxu1 %v1260_v11  ;;  %1153 = vmatpush3.bf16.msra.mxu0 %v1273_v21  ;;  %p1315_p1 = pneg %p1314_p0 }
  0x40   : > { %1154 = vmatprep.subr.bf16.mxu0 %v1427_v0 }
  0x42   : > { %662 = vmatpush1.bf16.msra.mxu1 %v1262_v12 }
  0x43   : > { %663 = vmatprep.subr.bf16.mxu1 %v1263_v13  ;;  %1155 = vmatpush3.bf16.msra.mxu0 %v1274_v22 }
  0x44   : > { %1156 = vmatprep.subr.bf16.mxu0 %v1427_v0 }
  0x46   : > { %664 = vmatpush1.bf16.msra.mxu1 %v1265_v14 }
  0x47   : > { %665 = vmatprep.subr.bf16.mxu1 %v1266_v15  ;;  %1157 = vmatpush3.bf16.msra.mxu0 %v1275_v23 }
  0x48   : > { %1158 = vmatprep.subr.bf16.mxu0 %v1427_v0 }
  0x4a   : > { %666 = vmatpush1.bf16.msra.mxu1 %v1268_v16 }
  0x4b   : > { %667 = vmatprep.subr.bf16.mxu1 %v1269_v17  ;;  %1159 = vmatpush3.bf16.msra.mxu0 %v1276_v24 }
  0x4c   : > { %1160 = vmatprep.subr.bf16.mxu0 %v1427_v0 }
  0x4e   : > { %668 = vmatpush1.bf16.msra.mxu1 %v1271_v18 }
  0x4f   : > { %1161 = vmatpush3.bf16.msra.mxu0 %v1277_v35 }
  0x50   : > { %1162 = vmatprep.subr.bf16.mxu0 %v1427_v0 }
  0x53   : > { %1163 = vmatpush3.bf16.msra.mxu0 %v1278_v36 }
  0x54   : > { %1164 = vmatprep.subr.bf16.mxu0 %v1427_v0 }
  0x57   : > { %1165 = vmatpush3.bf16.msra.mxu0 %v1279_v37 }
  0xf9   : > { %v535_v26 = vpop.f32.mrf.mxu0 }
  0xfa   : > { %v536_v28 = vadd.f32 %v1086_v25, %v535_v26 }
  0xfb   : > { %v1148_v27 = vpop.f32.mrf.mxu0 }
  0xfc   : > { %v542_v32 = vmax.f32 %v536_v28, 0.0 }
  0xfd   : > { %v538_v29 = vpop.f32.mrf.mxu0 }
  0xfe   : > { %v539_v30 = vadd.f32 %v1086_v25, %v538_v29 }
  0xff   : > { %v1149_v31 = vpop.f32.mrf.mxu0 }
 0x100   : > { %v543_v33 = vmax.f32 %v539_v30, 0.0 }
 0x102   : > { %v544_v34 = vpack.c.bf16 %v543_v33, %v542_v32 }
 0x104   : > { %686 = vmatmul.mubr.bf16.vlgmr.msra.gmra.mxu1 %v544_v34 }
 0x1c4   : > { %v687_v45 = vpop.f32.mrf.mxu1 }
 0x1c5   : > { %v688_v47 = vadd.f32 %v687_v45, %v566_v43 }
 0x1c6   : > { %v689_v46 = vpop.f32.mrf.mxu1 }
 0x1c7   : > { %v690_v48 = vadd.f32 %v689_v46, %v570_v44  ;;  %v696_v52 = vmax.f32 %v688_v47, 0.0 }
 0x1c8   : > { %v691_v49 = vpop.f32.mrf.mxu1 }
 0x1c9   : > { %698 = vst [vmem:[%s434_s15] sm:$0xff] %v690_v48  ;;  %v692_v50 = vadd.f32 %v691_v49, %v566_v43 }
 0x1ca   : > { %v693_v51 = vpop.f32.mrf.mxu1 }
 0x1cb   : > { %v697_v53 = vmax.f32 %v692_v50, 0.0  ;;  %v694_v54 = vadd.f32 %v693_v51, %v570_v44 }
 0x1cd   : > { %v700_v55 = vpack.c.bf16 %v697_v53, %v696_v52  ;;  %699 = vst [vmem:[%s434_s15 + $0x8] sm:$0xff] %v694_v54  ;;  %s1318_s15 = scalar_lea.vmem %s1317_s22, 512 }
 0x1ce   : > { %p1320_p5 = scmp.lt.s32.totalorder %s1318_s15, %s1312_s14 }
 0x1cf   : > { %1167 = vmatmul.mubr.bf16.vlgmr.msra.gmra.mxu0 %v700_v55 }
 0x1d0   : > { %p1321_p6 = por %p1320_p5, %p1319_p3 }
 0x1d2   : > { %p1322_p7 = pnand %p1321_p6, %p1315_p1 }
 0x28f   : > { %v806_v57 = vpop.f32.mrf.mxu0 }
 0x290   : > { %v807_v58 = vadd.f32 %v1106_v56, %v806_v57 }
 0x291   : > { %v1168_v59 = vpop.f32.mrf.mxu0 }
 0x292   : > { %v813_v60 = vmul.f32 %v807_v58, %v807_v58 }
 0x293   : > { %v809_v61 = vpop.f32.mrf.mxu0 }
 0x294   : > { %v810_v62 = vadd.f32 %v1106_v56, %v809_v61  ;;  %v815_v63 = vsel %vm497_vm1, %v813_v60, 0.0 }
 0x295   : > { %816 = vadd.xlane.f32.xlu0 %v815_v63  ;;  %v1169_v0 = vpop.f32.mrf.mxu0 }
 0x296   : > { %v814_v1 = vmul.f32 %v810_v62, %v810_v62 }
 0x298   : > { %v818_v2 = vsel %vm497_vm1, %v814_v1, 0.0 }
 0x299   : > { %819 = vadd.xlane.f32.xlu0 %v818_v2 }
 0x29a   : > { %1325 = shalt.err (!%p1322_p7)
}
 0x29b   : > { %s1326_s21 = scalar_lea.hbm %s1651_s16, 256  ;;  %s1330_s26 = scalar_lea.hbm %s1738_s7, 512 }
 0x29c   : > { %p1327_p10 = scmp.ne.s32.totalorder %s1651_s16, %s1326_s21  ;;  %p1331_p2 = scmp.lt.s32.totalorder %s1651_s16, %s1738_s7 }
 0x29d   : > { %p1332_p12 = scmp.lt.s32.totalorder %s1330_s26, %s1326_s21 }
 0x29e   : > { %p1328_p4 = pnand %p1327_p10, %p1532_p9 }
 0x29f   : > { %p1333_p8 = por %p1332_p12, %p1331_p2 }
 0x2a0   : > { %p1329_p13 = pneg %p1328_p4 }
 0x2a2   : > { %p1334_p0 = pnand %p1333_p8, %p1329_p13 }
 0x2a4   : > { %1337 = shalt.err (!%p1334_p0)
}
 0x2a5   : > { %s1431_s14 = smov 128   ;;  %s1432_s24 = smov 8   ;;  %vm835_vm2 = vcmask 125952  }
 0x2a6   : > { %1172 = dma.vmem_to_hbm [thread:$0]  (%p1532_p9), %s1645_s25, 256, %s1651_s16, %s839_s12, %s1431_s14, %s1431_s14, %s1432_s24  }
 0x2a7   : > { %s1078_s22 = sshll.u32 %s1565_s9, 3  ;;  %s1132_s15 = sshll.u32 %s1414_s30, 7 }
 0x2a8   : > { %s441_s21 = scalar_lea.vmem [#allocation6], %s1078_s22  ;;  %s1681_s12 = scalar_lea.hbm %s1739_s8, %s1132_s15 }
 0x2a9   : > { %s877_s13 = sshll.u32 %s441_s21, 4  ;;  %s844_s23 = scalar_lea.sflag [#allocation7], %s1565_s9  ;;  %s1683_s13 = int_to_ptr.vmem [resolvable:$true] %s877_s13 }
 0x2aa   : > { %s1338_s26 = scalar_lea.vmem %s1683_s13, 128  ;;  %s1433_s30 = smov [#allocation6]  }
 0x2ab   : > { %p1339_p1 = scmp.ne.s32.totalorder %s1683_s13, %s1338_s26  ;;  %s1342_s11 = sshll.u32 %s1433_s30, 4  ;;  %s1343_s11 = int_to_ptr.vmem [resolvable:$false] %s1342_s11 }
 0x2ac   : > { %s1344_s17 = scalar_lea.vmem %s1343_s11, 256  ;;  %p1345_p6 = scmp.lt.s32.totalorder %s1683_s13, %s1343_s11 }
 0x2ad   : > { %p1340_p3 = pnand %p1339_p1, %p1532_p9  ;;  %p1346_p7 = scmp.lt.s32.totalorder %s1344_s17, %s1338_s26 }
 0x2af   : > { %p1341_p5 = pneg %p1340_p3  ;;  %p1347_p10 = por %p1346_p7, %p1345_p6 }
 0x2b1   : > { %p1348_p4 = pnand %p1347_p10, %p1341_p5 }
 0x31e   : > { %v817_v3 = vpop.xlane.xlu0 %816 }
 0x31f   : > { %v821_v4 = vmax.f32 %v817_v3, 1e-24 }
 0x321   : > { %1280 = vrsqrt.f32 %v821_v4 }
 0x322   : > { %v820_v5 = vpop.xlane.xlu0 %819 }
 0x323   : > { %v822_v6 = vmax.f32 %v820_v5, 1e-24 }
 0x325   : > { %1282 = vrsqrt.f32 %v822_v6 }
 0x32e   : > { %v1281_v7 = vpop.eup %1280 }
 0x32f   : > { %v825_v8 = vmul.f32 %v1281_v7, %v807_v58 }
 0x331   : > { %v1129_v9 = vpack.c.bf16 %v825_v8, %v825_v8 }
 0x332   : > { %v1283_v10 = vpop.eup %1282 }
 0x333   : > { %v826_v11 = vmul.f32 %v1283_v10, %v810_v62  ;;  %836 = vst.msk [vmem:[%s441_s21] sm:$0xf] %vm835_vm2, %v1129_v9 }
 0x335   : > { %v1130_v12 = vpack.c.bf16 %v826_v11, %v826_v11 }
 0x337   : > { %837 = vst.msk [vmem:[%s441_s21 + $0x4] sm:$0xf] %vm835_vm2, %v1130_v12 }
 0x338   : > { %1351 = shalt.err (!%p1348_p4)
}
 0x339   : > { %s1352_s14 = scalar_lea.hbm %s1681_s12, 128  ;;  %s1356_s15 = scalar_lea.hbm %s1739_s8, 256 }
 0x33a   : > { %p1353_p13 = scmp.ne.s32.totalorder %s1681_s12, %s1352_s14  ;;  %p1357_p8 = scmp.lt.s32.totalorder %s1681_s12, %s1739_s8 }
 0x33b   : > { %p1358_p0 = scmp.lt.s32.totalorder %s1356_s15, %s1352_s14 }
 0x33c   : > { %p1354_p2 = pnand %p1353_p13, %p1532_p9 }
 0x33d   : > { %p1359_p1 = por %p1358_p0, %p1357_p8 }
 0x33e   : > { %p1355_p12 = pneg %p1354_p2 }
 0x340   : > { %p1360_p3 = pnand %p1359_p1, %p1355_p12 }
 0x342   : > { %1363 = shalt.err (!%p1360_p3)
}
 0x343   : > { %s1434_s16 = smov 64   ;;  %s1435_s26 = smov 4  }
 0x344   : > { %1173 = dma.vmem_to_hbm [thread:$0]  (%p1532_p9), %s1683_s13, 128, %s1681_s12, %s844_s23, %s1434_s16, %s1434_s16, %s1435_s26  }
 0x345 PF: > { %s892_s30 = sand.u32 1, %s1402_s27   ;;  %p1749_p5 = scmp.ge.s32.totalorder %s1422_s10, 2 }
 0x346   : > { %s893_s11 = scalar_lea.sflag [#allocation4], %s892_s30 }
 0x347   : > { %p1181_p6 = pnand %p1749_p5, %p1539_p11 }
 0x349   : > { %p1182_p7 = pneg %p1181_p6 }
 0x34b   : > { %1393 = dma.done.wait (%p1182_p7), %s893_s11, 256  }
 0x34c   : > { %1395 = vsyncadd (%p1182_p7), %s893_s11, 4294967040  ;;  %s902_s17 = scalar_lea.sflag [#allocation7], %s892_s30 }
 0x34d   : > { %1397 = dma.done.wait (%p1182_p7), %s902_s17, 128  }
 0x34e   : > { %1399 = vsyncadd (%p1182_p7), %s902_s17, 4294967168  ;;  %s28_s10 = sadd.s32 1, %s1422_s10   ;;  %s1750_s30 = sld [smem:[#allocation11_spill]] }
 0x34f   : > { %p25_p10 = scmp.ge.s32.totalorder %s28_s10, 4   ;;  %s1751_s9 = sld [smem:[#allocation12_spill]] }
 0x350   : > { %s1752_s27 = smov %s1406_s28  ;;  %s1753_s28 = smov %s1410_s29 }
 0x351   : > { %s1754_s29 = smov %s1537_s19  ;;  %27 = sbr.rel (!%p25_p10) target bundleno = 8 (0x8), region = 128 }
 0x356   :  { %907 = vsyncpa [#allocation3], 1 }
 0x357   :  { %909 = vsyncpa [#allocation3 + $0x1], 1 }
 0x358   :  { %910 = vsyncpa [#allocation4], 1 }
 0x359   :  { %912 = vsyncpa [#allocation4 + $0x1], 1 }
 0x35a   :  { %913 = vsyncpa [#allocation7], 1 }
 0x35b   :  { %915 = vsyncpa [#allocation7 + $0x1], 1 }

</bundles_post_ra>
